<compile_context>
chip_gen: v7x
topology: tpu7x:2x2x1
jax: 0.10.0
libtpu: 0.0.40
codegen_flags: <defaults>
</compile_context>

<pallas_src>
import jax
import jax.numpy as jnp
from jax.experimental import pallas as pl
from jax.experimental.pallas import tpu as pltpu


def _cdiv(a, b):
    return -(-a // b)


def _round_up(a, b):
    return _cdiv(a, b) * b


def _round8(d):
    return _round_up(d, 8)


def _nconv_kernel(x_ref, a_ref, o_ref):
    # x_ref: (F, N, TM)  = x[b, :, :, m_tile]          (m on lanes)
    # a_ref: (N, V, TM)  = A[b, m_tile, :, :]^T        (m on lanes)
    # o_ref: (F, V, TM)  = out[b, :, :, m_tile]        (lane-dense store)
    n_dim = x_ref.shape[1]
    # Per-n slices only: no upfront full-block astype (no-op for f32 inputs,
    # and keeps bf16 widening / VMEM temporaries small on all generations).
    xn = x_ref[:, 0, :].astype(jnp.float32)            # (F, TM)
    an = a_ref[0].astype(jnp.float32)                  # (V, TM)
    acc = xn[:, None, :] * an[None, :, :]              # (F, V, TM) f32 acc
    for n in range(1, n_dim):                          # static unroll over N
        xn = x_ref[:, n, :].astype(jnp.float32)
        an = a_ref[n].astype(jnp.float32)
        acc = acc + xn[:, None, :] * an[None, :, :]
    o_ref[...] = acc.astype(o_ref.dtype)


def _vmem_budgets():
    """Generation-aware VMEM sizing (v5e/v6e: 128 MiB, v7x: 64 MiB per TC)."""
    cap = 64 << 20  # conservative fallback = v7x per-TensorCore capacity
    try:
        info = pltpu.get_tpu_info()
        cap = int(getattr(info, "vmem_capacity_bytes", cap))
    except Exception:
        pass
    budget = min((cap * 3) // 8, 48 << 20)  # tile-sizing budget (24 MiB on v7x)
    limit = min(cap // 2, 64 << 20)         # scoped VMEM handed to Mosaic
    return budget, limit, cap


def _per_m_bytes(F, N, V, x_isz, a_isz, o_isz):
    """Per-m VMEM bytes for one pipelined step, sublane-rounded.

    Counts double-buffered x/A/out tiles (second-minor dims pad to 8 sublanes)
    plus the in-kernel f32 accumulator and one live f32 intermediate.
    """
    xb = F * _round8(N) * x_isz
    ab = N * _round8(V) * a_isz
    ob = F * _round8(V) * o_isz
    tmp = 2 * F * _round8(V) * 4
    return 2 * (xb + ab + ob) + tmp


def _pick_tm(M, B, per_m_bytes, budget):
    """Pick the m-tile TM (multiple of 128) and the padded extent m_pad.

    TM is decoupled from M's divisors: find the largest tile that fits the
    VMEM budget, then balance it across ceil-divided steps so padding is
    minimal.  With B == 1 we force >= 2 m-steps so both v7x TCs get work.
    """
    m128 = _round_up(M, 128)
    fit = max(128, (budget // per_m_bytes) // 128 * 128)
    fit = min(fit, m128)
    steps = _cdiv(m128, fit)
    if B == 1 and m128 >= 256:
        steps = max(steps, 2)
    tm = _round_up(_cdiv(m128, steps), 128)
    steps = _cdiv(m128, tm)
    return tm, tm * steps


def nconv(x, A, *, A_is_nvm=False, tm=None):
    """out = einsum('bfnm,bmnv->bfvm', x, A).

    x: (B, F, N, M)
    A: (B, M, N, V) if A_is_nvm=False (torch layout), or
       (B, N, V, M) if A_is_nvm=True (pre-transposed upstream; skips one full
       HBM read+write of A per call when A is reused across layers/timesteps).
    returns: (B, F, V, M)
    """
    B, F, N, M = x.shape
    if A_is_nvm:
        assert A.shape[0] == B and A.shape[1] == N and A.shape[3] == M, (
            x.shape, A.shape)
        V = A.shape[2]
        A_t = A
    else:
        assert A.shape[:3] == (B, M, N), (x.shape, A.shape)
        V = A.shape[3]
        # Single layout change: put m on A's lane axis.  Cache this upstream
        # (A_is_nvm=True) when A is reused to avoid the extra HBM pass.
        A_t = jnp.transpose(A, (0, 2, 3, 1))  # (B, N, V, M)

    out_dtype = jnp.result_type(x.dtype, A.dtype)
    x_isz = jnp.dtype(x.dtype).itemsize
    a_isz = jnp.dtype(A.dtype).itemsize
    o_isz = jnp.dtype(out_dtype).itemsize

    budget, vmem_limit, cap = _vmem_budgets()
    per_m = _per_m_bytes(F, N, V, x_isz, a_isz, o_isz)

    if tm is None:
        tm, m_pad = _pick_tm(M, B, per_m, budget)
    else:
        assert tm % 128 == 0 and tm > 0
        m_pad = _round_up(M, tm)

    # Ensure the scoped VMEM limit covers the chosen working set (covers the
    # forced tm=128 case for very large F/V), never exceeding capacity.
    vmem_limit = int(min(max(vmem_limit, tm * per_m + (2 << 20)), cap))

    if m_pad != M:
        # No-op when M is already a multiple of the tile (arrange upstream).
        x = jnp.pad(x, ((0, 0), (0, 0), (0, 0), (0, m_pad - M)))
        A_t = jnp.pad(A_t, ((0, 0), (0, 0), (0, 0), (0, m_pad - M)))

    grid = (B, m_pad // tm)

    cost = pl.CostEstimate(
        flops=2 * B * F * N * V * M,
        transcendentals=0,
        bytes_accessed=(B * F * N * M) * x_isz
        + (B * M * N * V) * a_isz
        + (B * F * V * M) * o_isz,
    )

    out = pl.pallas_call(
        _nconv_kernel,
        out_shape=jax.ShapeDtypeStruct((B, F, V, m_pad), out_dtype),
        grid_spec=pltpu.PrefetchScalarGridSpec(
            num_scalar_prefetch=0,
            grid=grid,
            in_specs=[
                pl.BlockSpec((None, F, N, tm), lambda b, mt: (b, 0, 0, mt)),
                pl.BlockSpec((None, N, V, tm), lambda b, mt: (b, 0, 0, mt)),
            ],
            out_specs=pl.BlockSpec((None, F, V, tm), lambda b, mt: (b, 0, 0, mt)),
        ),
        compiler_params=pltpu.CompilerParams(
            dimension_semantics=("parallel", "parallel"),
            vmem_limit_bytes=vmem_limit,
        ),
        cost_estimate=cost,
    )(x, A_t)

    if m_pad != M:
        out = out[..., :M]
    return out


if __name__ == "__main__":
    key = jax.random.PRNGKey(0)
    kx, ka = jax.random.split(key)

    # shapes consistent with 'bfnm,bmnv->bfvm': batch=2, channels F=4,
    # contraction N=8, nodes M=256 (multiple of 128 -> no pad/slice), V=5.
    B, F, N, M, V = 2, 4, 8, 256, 5
    x = jax.random.normal(kx, (B, F, N, M), dtype=jnp.float32)
    A = jax.random.normal(ka, (B, M, N, V), dtype=jnp.float32)

    out = jax.block_until_ready(nconv(x, A))

    # reference check against plain-JAX einsum (same contraction as torch)
    ref = jnp.einsum("bfnm,bmnv->bfvm", x, A)
    assert out.shape == (B, F, V, M)
    assert jnp.allclose(out, ref, atol=1e-4, rtol=1e-4), float(
        jnp.max(jnp.abs(out - ref))
    )

    print("KERNEL_OK")
</pallas_src>

<mosaic_0001>
module attributes {stable_mosaic.version = 11 : i64} {
  func.func @_nconv_kernel(%arg0: i32, %arg1: i32, %arg2: memref<1x4x8x256xf32, #tpu.memory_space<vmem>>, %arg3: memref<1x8x5x256xf32, #tpu.memory_space<vmem>>, %arg4: memref<1x4x5x256xf32, #tpu.memory_space<vmem>>) attributes {dimension_semantics = [#tpu.dimension_semantics<parallel>, #tpu.dimension_semantics<parallel>], iteration_bounds = array<i64: 2, 1>, scalar_prefetch = 0 : i64, scratch_operands = 0 : i64, tpu.core_type = #tpu.core_type<tc>, window_params = [{transform_indices = @transform_0, window_bounds = array<i64: 1, 4, 8, 256>}, {transform_indices = @transform_1, window_bounds = array<i64: 1, 8, 5, 256>}, {transform_indices = @transform_2, window_bounds = array<i64: 1, 4, 5, 256>}]} {
    %c0 = arith.constant 0 : index
    %c0_0 = arith.constant 0 : index
    %c0_1 = arith.constant 0 : index
    %c0_2 = arith.constant 0 : index
    %0 = vector.load %arg2[%c0, %c0_0, %c0_1, %c0_2] : memref<1x4x8x256xf32, #tpu.memory_space<vmem>>, vector<1x4x1x256xf32>
    %1 = vector.shape_cast %0 : vector<1x4x1x256xf32> to vector<4x256xf32>
    %c0_3 = arith.constant 0 : index
    %c0_4 = arith.constant 0 : index
    %c0_5 = arith.constant 0 : index
    %c0_6 = arith.constant 0 : index
    %2 = vector.load %arg3[%c0_3, %c0_4, %c0_5, %c0_6] : memref<1x8x5x256xf32, #tpu.memory_space<vmem>>, vector<1x1x5x256xf32>
    %3 = vector.shape_cast %2 : vector<1x1x5x256xf32> to vector<5x256xf32>
    %4 = vector.shape_cast %1 : vector<4x256xf32> to vector<4x1x256xf32>
    %5 = vector.shape_cast %3 : vector<5x256xf32> to vector<1x5x256xf32>
    %6 = vector.broadcast %4 : vector<4x1x256xf32> to vector<4x5x256xf32>
    %7 = vector.broadcast %5 : vector<1x5x256xf32> to vector<4x5x256xf32>
    %8 = arith.mulf %6, %7 : vector<4x5x256xf32>
    %c0_7 = arith.constant 0 : index
    %c0_8 = arith.constant 0 : index
    %c1 = arith.constant 1 : index
    %c0_9 = arith.constant 0 : index
    %9 = vector.load %arg2[%c0_7, %c0_8, %c1, %c0_9] : memref<1x4x8x256xf32, #tpu.memory_space<vmem>>, vector<1x4x1x256xf32>
    %10 = vector.shape_cast %9 : vector<1x4x1x256xf32> to vector<4x256xf32>
    %c0_10 = arith.constant 0 : index
    %c1_11 = arith.constant 1 : index
    %c0_12 = arith.constant 0 : index
    %c0_13 = arith.constant 0 : index
    %11 = vector.load %arg3[%c0_10, %c1_11, %c0_12, %c0_13] : memref<1x8x5x256xf32, #tpu.memory_space<vmem>>, vector<1x1x5x256xf32>
    %12 = vector.shape_cast %11 : vector<1x1x5x256xf32> to vector<5x256xf32>
    %13 = vector.shape_cast %10 : vector<4x256xf32> to vector<4x1x256xf32>
    %14 = vector.shape_cast %12 : vector<5x256xf32> to vector<1x5x256xf32>
    %15 = vector.broadcast %13 : vector<4x1x256xf32> to vector<4x5x256xf32>
    %16 = vector.broadcast %14 : vector<1x5x256xf32> to vector<4x5x256xf32>
    %17 = arith.mulf %15, %16 : vector<4x5x256xf32>
    %18 = arith.addf %8, %17 : vector<4x5x256xf32>
    %c0_14 = arith.constant 0 : index
    %c0_15 = arith.constant 0 : index
    %c2 = arith.constant 2 : index
    %c0_16 = arith.constant 0 : index
    %19 = vector.load %arg2[%c0_14, %c0_15, %c2, %c0_16] : memref<1x4x8x256xf32, #tpu.memory_space<vmem>>, vector<1x4x1x256xf32>
    %20 = vector.shape_cast %19 : vector<1x4x1x256xf32> to vector<4x256xf32>
    %c0_17 = arith.constant 0 : index
    %c2_18 = arith.constant 2 : index
    %c0_19 = arith.constant 0 : index
    %c0_20 = arith.constant 0 : index
    %21 = vector.load %arg3[%c0_17, %c2_18, %c0_19, %c0_20] : memref<1x8x5x256xf32, #tpu.memory_space<vmem>>, vector<1x1x5x256xf32>
    %22 = vector.shape_cast %21 : vector<1x1x5x256xf32> to vector<5x256xf32>
    %23 = vector.shape_cast %20 : vector<4x256xf32> to vector<4x1x256xf32>
    %24 = vector.shape_cast %22 : vector<5x256xf32> to vector<1x5x256xf32>
    %25 = vector.broadcast %23 : vector<4x1x256xf32> to vector<4x5x256xf32>
    %26 = vector.broadcast %24 : vector<1x5x256xf32> to vector<4x5x256xf32>
    %27 = arith.mulf %25, %26 : vector<4x5x256xf32>
    %28 = arith.addf %18, %27 : vector<4x5x256xf32>
    %c0_21 = arith.constant 0 : index
    %c0_22 = arith.constant 0 : index
    %c3 = arith.constant 3 : index
    %c0_23 = arith.constant 0 : index
    %29 = vector.load %arg2[%c0_21, %c0_22, %c3, %c0_23] : memref<1x4x8x256xf32, #tpu.memory_space<vmem>>, vector<1x4x1x256xf32>
    %30 = vector.shape_cast %29 : vector<1x4x1x256xf32> to vector<4x256xf32>
    %c0_24 = arith.constant 0 : index
    %c3_25 = arith.constant 3 : index
    %c0_26 = arith.constant 0 : index
    %c0_27 = arith.constant 0 : index
    %31 = vector.load %arg3[%c0_24, %c3_25, %c0_26, %c0_27] : memref<1x8x5x256xf32, #tpu.memory_space<vmem>>, vector<1x1x5x256xf32>
    %32 = vector.shape_cast %31 : vector<1x1x5x256xf32> to vector<5x256xf32>
    %33 = vector.shape_cast %30 : vector<4x256xf32> to vector<4x1x256xf32>
    %34 = vector.shape_cast %32 : vector<5x256xf32> to vector<1x5x256xf32>
    %35 = vector.broadcast %33 : vector<4x1x256xf32> to vector<4x5x256xf32>
    %36 = vector.broadcast %34 : vector<1x5x256xf32> to vector<4x5x256xf32>
    %37 = arith.mulf %35, %36 : vector<4x5x256xf32>
    %38 = arith.addf %28, %37 : vector<4x5x256xf32>
    %c0_28 = arith.constant 0 : index
    %c0_29 = arith.constant 0 : index
    %c4 = arith.constant 4 : index
    %c0_30 = arith.constant 0 : index
    %39 = vector.load %arg2[%c0_28, %c0_29, %c4, %c0_30] : memref<1x4x8x256xf32, #tpu.memory_space<vmem>>, vector<1x4x1x256xf32>
    %40 = vector.shape_cast %39 : vector<1x4x1x256xf32> to vector<4x256xf32>
    %c0_31 = arith.constant 0 : index
    %c4_32 = arith.constant 4 : index
    %c0_33 = arith.constant 0 : index
    %c0_34 = arith.constant 0 : index
    %41 = vector.load %arg3[%c0_31, %c4_32, %c0_33, %c0_34] : memref<1x8x5x256xf32, #tpu.memory_space<vmem>>, vector<1x1x5x256xf32>
    %42 = vector.shape_cast %41 : vector<1x1x5x256xf32> to vector<5x256xf32>
    %43 = vector.shape_cast %40 : vector<4x256xf32> to vector<4x1x256xf32>
    %44 = vector.shape_cast %42 : vector<5x256xf32> to vector<1x5x256xf32>
    %45 = vector.broadcast %43 : vector<4x1x256xf32> to vector<4x5x256xf32>
    %46 = vector.broadcast %44 : vector<1x5x256xf32> to vector<4x5x256xf32>
    %47 = arith.mulf %45, %46 : vector<4x5x256xf32>
    %48 = arith.addf %38, %47 : vector<4x5x256xf32>
    %c0_35 = arith.constant 0 : index
    %c0_36 = arith.constant 0 : index
    %c5 = arith.constant 5 : index
    %c0_37 = arith.constant 0 : index
    %49 = vector.load %arg2[%c0_35, %c0_36, %c5, %c0_37] : memref<1x4x8x256xf32, #tpu.memory_space<vmem>>, vector<1x4x1x256xf32>
    %50 = vector.shape_cast %49 : vector<1x4x1x256xf32> to vector<4x256xf32>
    %c0_38 = arith.constant 0 : index
    %c5_39 = arith.constant 5 : index
    %c0_40 = arith.constant 0 : index
    %c0_41 = arith.constant 0 : index
    %51 = vector.load %arg3[%c0_38, %c5_39, %c0_40, %c0_41] : memref<1x8x5x256xf32, #tpu.memory_space<vmem>>, vector<1x1x5x256xf32>
    %52 = vector.shape_cast %51 : vector<1x1x5x256xf32> to vector<5x256xf32>
    %53 = vector.shape_cast %50 : vector<4x256xf32> to vector<4x1x256xf32>
    %54 = vector.shape_cast %52 : vector<5x256xf32> to vector<1x5x256xf32>
    %55 = vector.broadcast %53 : vector<4x1x256xf32> to vector<4x5x256xf32>
    %56 = vector.broadcast %54 : vector<1x5x256xf32> to vector<4x5x256xf32>
    %57 = arith.mulf %55, %56 : vector<4x5x256xf32>
    %58 = arith.addf %48, %57 : vector<4x5x256xf32>
    %c0_42 = arith.constant 0 : index
    %c0_43 = arith.constant 0 : index
    %c6 = arith.constant 6 : index
    %c0_44 = arith.constant 0 : index
    %59 = vector.load %arg2[%c0_42, %c0_43, %c6, %c0_44] : memref<1x4x8x256xf32, #tpu.memory_space<vmem>>, vector<1x4x1x256xf32>
    %60 = vector.shape_cast %59 : vector<1x4x1x256xf32> to vector<4x256xf32>
    %c0_45 = arith.constant 0 : index
    %c6_46 = arith.constant 6 : index
    %c0_47 = arith.constant 0 : index
    %c0_48 = arith.constant 0 : index
    %61 = vector.load %arg3[%c0_45, %c6_46, %c0_47, %c0_48] : memref<1x8x5x256xf32, #tpu.memory_space<vmem>>, vector<1x1x5x256xf32>
    %62 = vector.shape_cast %61 : vector<1x1x5x256xf32> to vector<5x256xf32>
    %63 = vector.shape_cast %60 : vector<4x256xf32> to vector<4x1x256xf32>
    %64 = vector.shape_cast %62 : vector<5x256xf32> to vector<1x5x256xf32>
    %65 = vector.broadcast %63 : vector<4x1x256xf32> to vector<4x5x256xf32>
    %66 = vector.broadcast %64 : vector<1x5x256xf32> to vector<4x5x256xf32>
    %67 = arith.mulf %65, %66 : vector<4x5x256xf32>
    %68 = arith.addf %58, %67 : vector<4x5x256xf32>
    %c0_49 = arith.constant 0 : index
    %c0_50 = arith.constant 0 : index
    %c7 = arith.constant 7 : index
    %c0_51 = arith.constant 0 : index
    %69 = vector.load %arg2[%c0_49, %c0_50, %c7, %c0_51] : memref<1x4x8x256xf32, #tpu.memory_space<vmem>>, vector<1x4x1x256xf32>
    %70 = vector.shape_cast %69 : vector<1x4x1x256xf32> to vector<4x256xf32>
    %c0_52 = arith.constant 0 : index
    %c7_53 = arith.constant 7 : index
    %c0_54 = arith.constant 0 : index
    %c0_55 = arith.constant 0 : index
    %71 = vector.load %arg3[%c0_52, %c7_53, %c0_54, %c0_55] : memref<1x8x5x256xf32, #tpu.memory_space<vmem>>, vector<1x1x5x256xf32>
    %72 = vector.shape_cast %71 : vector<1x1x5x256xf32> to vector<5x256xf32>
    %73 = vector.shape_cast %70 : vector<4x256xf32> to vector<4x1x256xf32>
    %74 = vector.shape_cast %72 : vector<5x256xf32> to vector<1x5x256xf32>
    %75 = vector.broadcast %73 : vector<4x1x256xf32> to vector<4x5x256xf32>
    %76 = vector.broadcast %74 : vector<1x5x256xf32> to vector<4x5x256xf32>
    %77 = arith.mulf %75, %76 : vector<4x5x256xf32>
    %78 = arith.addf %68, %77 : vector<4x5x256xf32>
    %c0_56 = arith.constant 0 : index
    %c0_57 = arith.constant 0 : index
    %c0_58 = arith.constant 0 : index
    %c0_59 = arith.constant 0 : index
    %79 = vector.load %arg4[%c0_56, %c0_57, %c0_58, %c0_59] : memref<1x4x5x256xf32, #tpu.memory_space<vmem>>, vector<1x4x5x256xf32>
    %80 = vector.shape_cast %79 : vector<1x4x5x256xf32> to vector<4x5x256xf32>
    %81 = vector.shape_cast %78 : vector<4x5x256xf32> to vector<1x4x5x256xf32>
    tpu.vector_store %arg4[%c0_56, %c0_57, %c0_58, %c0_59], %81 {strides = array<i32>} : memref<1x4x5x256xf32, #tpu.memory_space<vmem>>, vector<1x4x5x256xf32>,
    return
  }
  func.func @transform_0(%arg0: i32, %arg1: i32) -> (i32, i32, i32, i32) {
    %c0_i32 = arith.constant 0 : i32
    %c0_i32_0 = arith.constant 0 : i32
    %c0_i32_1 = arith.constant 0 : i32
    return %arg0, %c0_i32, %c0_i32_0, %arg1 : i32, i32, i32, i32
  }
  func.func @transform_1(%arg0: i32, %arg1: i32) -> (i32, i32, i32, i32) {
    %c0_i32 = arith.constant 0 : i32
    %c0_i32_0 = arith.constant 0 : i32
    %c0_i32_1 = arith.constant 0 : i32
    return %arg0, %c0_i32, %c0_i32_0, %arg1 : i32, i32, i32, i32
  }
  func.func @transform_2(%arg0: i32, %arg1: i32) -> (i32, i32, i32, i32) {
    %c0_i32 = arith.constant 0 : i32
    %c0_i32_0 = arith.constant 0 : i32
    %c0_i32_1 = arith.constant 0 : i32
    return %arg0, %c0_i32, %c0_i32_0, %arg1 : i32, i32, i32, i32
  }
}

</mosaic_0001>

<bundles_post_ra>
// kernel: tpu_custom_call.1
= control target key start
LH: loop header
LB: loop body
LE: loop exit
PB: predicated region body
PF: predicated region fallthrough
CT: control target
= control target key end

     0   :  { %s1014_s9 = smov 0   ;;  %s1016_s10 = smov 0   ;;  %s1288_s0 = inlined_call_operand.vmem [shape: f32[2,4,8,256], index: 0, kind: input, shape index: {}]   ;;  %s1289_s1 = inlined_call_operand.vmem [shape: f32[2,8,5,256], index: 1, kind: input, shape index: {}]   ;;  %s1290_s2 = inlined_call_operand.vmem [shape: f32[2,4,5,256], index: 2, kind: output, shape index: {}]  }
   0x1   :  { %s1018_s11 = smov 0  }
   0x2 LB: > { %s24_s12 = sadd.s32 1, %s993_s10  ;;  %p894_p0 = scmp.ge.s32.totalorder %s997_s11, 1  ;;  %s997_s11 = sphi %s1018_s11, %s12_s11   ;;  %s993_s10 = sphi %s1016_s10, %s1292_s10   ;;  %s989_s9 = sphi %s1014_s9, %s1291_s9  }
   0x3   : > { %p26_p1 = scmp.ge.s32.totalorder %s24_s12, 2  ;;  %p150_p2 = scmp.lt.s32.totalorder %s997_s11, 3 }
   0x5   : > { %s1294_s12 = smov (%p26_p1, %s24_s12), 0  ;;  %p151_p3 = pnand %p894_p0, %p150_p2 }
   0x6   : > { %p190_p4 = scmp.lt.s32.totalorder (!%p151_p3), %s989_s9, 1  ;;  %v232_v0 = vlaneseq (!%p151_p3) }
   0x7   : > { %154 = sbr.rel (%p151_p3) target bundleno = 75 (0x4b), region = 28 }
   0x8   : > { %v233_v1 = vshrl.u32 (!%p151_p3), %v232_v0, 7 }
   0xa   : > { %v1036_v2 = vsub.s32 (!%p151_p3), 0, %v233_v1  ;;  %v1054_v5 = vsub.s32 (!%p151_p3), 1, %v233_v1 }
   0xe   : > { %s1296_s9 = smov (!%p190_p4, %s989_s9), 1 }
   0xf   : > { %s948_s13 = sshll.u32 %s1296_s9, 6  ;;  %s949_s14 = sshll.u32 %s1296_s9, 7 }
  0x10   : > { %s1043_s17 = scalar_lea.vmem %s1288_s0, %s948_s13  ;;  %s1048_s20 = scalar_lea.vmem %s1289_s1, %s949_s14 }
  0x11   : > { %v219_v3 = vld [vmem:[%s1043_s17] ss:$8 sm:$0x3]  ;;  %v904_v7 = vld [vmem:[%s1043_s17 + $0x1] ss:$8 sm:$0x3]  ;;  %s1167_s23 = scalar_lea.vmem %s1290_s2, %s948_s13 }
  0x12   : > { %v1052_v4 = vld [vmem:[%s1048_s20] sm:$0x1f]  ;;  %v235_v6 = vrot.slane %v219_v3, %v1036_v2  ;;  %v1059_v8 = vld [vmem:[%s1048_s20 + $0x10] sm:$0x1f]  ;;  %v298_v9 = vrot.slane %v904_v7, %v1036_v2  ;;  %v239_v20 = vrot.slane %v219_v3, %v1054_v5  ;;  %v302_v25 = vrot.slane %v904_v7, %v1054_v5  ;;  %v1104_v41 = vld [vmem:[%s1048_s20 + $0x8] sm:$0x1f] }
  0x13   : > { %v910_v10 = vld [vmem:[%s1043_s17 + $0x2] ss:$8 sm:$0x3]  ;;  %v916_v14 = vld [vmem:[%s1043_s17 + $0x3] ss:$8 sm:$0x3] }
  0x14   : > { %v1064_v11 = vld [vmem:[%s1048_s20 + $0x20] sm:$0x1f]  ;;  %v272_v12 = vmul.f32 %v235_v6, %v1052_v4  ;;  %v369_v13 = vrot.slane %v910_v10, %v1036_v2  ;;  %v1070_v15 = vld [vmem:[%s1048_s20 + $0x30] sm:$0x1f]  ;;  %v335_v16 = vmul.f32 %v1059_v8, %v298_v9  ;;  %v440_v17 = vrot.slane %v916_v14, %v1036_v2  ;;  %v1107_v42 = vld [vmem:[%s1048_s20 + $0x18] sm:$0x1f] }
  0x15   : > { %v922_v18 = vld [vmem:[%s1043_s17 + $0x4] ss:$8 sm:$0x3]  ;;  %v928_v23 = vld [vmem:[%s1043_s17 + $0x5] ss:$8 sm:$0x3]  ;;  %v373_v26 = vrot.slane %v910_v10, %v1054_v5  ;;  %v444_v35 = vrot.slane %v916_v14, %v1054_v5  ;;  %v273_v46 = vmul.f32 %v239_v20, %v1104_v41  ;;  %v336_v47 = vmul.f32 %v1107_v42, %v302_v25 }
  0x16   : > { %v1076_v19 = vld [vmem:[%s1048_s20 + $0x40] sm:$0x1f]  ;;  %v406_v21 = vmul.f32 %v1064_v11, %v369_v13  ;;  %v511_v22 = vrot.slane %v922_v18, %v1036_v2  ;;  %v1083_v24 = vld [vmem:[%s1048_s20 + $0x50] sm:$0x1f]  ;;  %v343_v27 = vadd.f32 %v335_v16, %v272_v12  ;;  %v477_v28 = vmul.f32 %v1070_v15, %v440_v17  ;;  %v1110_v43 = vld [vmem:[%s1048_s20 + $0x28] sm:$0x1f] }
  0x17   : > { %v582_v29 = vrot.slane %v928_v23, %v1036_v2  ;;  %v934_v30 = vld [vmem:[%s1043_s17 + $0x6] ss:$8 sm:$0x3]  ;;  %v1091_v31 = vld [vmem:[%s1048_s20 + $0x60] sm:$0x1f]  ;;  %v515_v36 = vrot.slane %v922_v18, %v1054_v5  ;;  %v586_v37 = vrot.slane %v928_v23, %v1054_v5  ;;  %v407_v48 = vmul.f32 %v1110_v43, %v373_v26 }
  0x18   : > { %v653_v32 = vrot.slane %v934_v30, %v1036_v2  ;;  %v940_v33 = vld [vmem:[%s1043_s17 + $0x7] ss:$8 sm:$0x3]  ;;  %v1096_v34 = vld [vmem:[%s1048_s20 + $0x70] sm:$0x1f]  ;;  %v414_v38 = vadd.f32 %v406_v21, %v343_v27  ;;  %v548_v39 = vmul.f32 %v1076_v19, %v511_v22  ;;  %v657_v44 = vrot.slane %v934_v30, %v1054_v5 }
  0x19   : > { %v724_v40 = vrot.slane %v940_v33, %v1036_v2  ;;  %v619_v45 = vmul.f32 %v1083_v24, %v582_v29  ;;  %v1118_v49 = vld [vmem:[%s1048_s20 + $0x38] sm:$0x1f]  ;;  %v1121_v50 = vld [vmem:[%s1048_s20 + $0x48] sm:$0x1f]  ;;  %v728_v56 = vrot.slane %v940_v33, %v1054_v5  ;;  %v344_v57 = vadd.f32 %v336_v47, %v273_v46 }
  0x1a   : > { %v1124_v51 = vld [vmem:[%s1048_s20 + $0x58] sm:$0x1f]  ;;  %v485_v52 = vadd.f32 %v477_v28, %v414_v38  ;;  %v690_v53 = vmul.f32 %v1091_v31, %v653_v32  ;;  %v1129_v55 = vld [vmem:[%s1048_s20 + $0x68] sm:$0x1f]  ;;  %v478_v58 = vmul.f32 %v1118_v49, %v444_v35  ;;  %v549_v59 = vmul.f32 %v1121_v50, %v515_v36 }
  0x1b   : > { %v761_v54 = vmul.f32 %v1096_v34, %v724_v40  ;;  %v620_v60 = vmul.f32 %v1124_v51, %v586_v37  ;;  %v1136_v61 = vld [vmem:[%s1048_s20 + $0x78] sm:$0x1f]  ;;  %v415_v10 = vadd.f32 %v407_v48, %v344_v57  ;;  %v929_v16 = vld [vmem:[%s1043_s17 + $0x15] ss:$8 sm:$0x3]  ;;  %v691_v26 = vmul.f32 %v1129_v55, %v657_v44 }
  0x1c   : > { %v901_v62 = vld [vmem:[%s1043_s17 + $0x10] ss:$8 sm:$0x3]  ;;  %v905_v63 = vld [vmem:[%s1043_s17 + $0x11] ss:$8 sm:$0x3]  ;;  %v556_v0 = vadd.f32 %v548_v39, %v485_v52  ;;  %v590_v28 = vrot.slane %v929_v16, %v1036_v2  ;;  %v762_v32 = vmul.f32 %v1136_v61, %v728_v56 }
  0x1d   : > { %v243_v1 = vrot.slane %v901_v62, %v1036_v2  ;;  %v306_v3 = vrot.slane %v905_v63, %v1036_v2  ;;  %v911_v6 = vld [vmem:[%s1043_s17 + $0x12] ss:$8 sm:$0x3]  ;;  %v917_v7 = vld [vmem:[%s1043_s17 + $0x13] ss:$8 sm:$0x3]  ;;  %v247_v9 = vrot.slane %v901_v62, %v1054_v5  ;;  %v310_v17 = vrot.slane %v905_v63, %v1054_v5 }
  0x1e   : > { %v377_v12 = vrot.slane %v911_v6, %v1036_v2  ;;  %v448_v13 = vrot.slane %v917_v7, %v1036_v2  ;;  %v923_v14 = vld [vmem:[%s1043_s17 + $0x14] ss:$8 sm:$0x3]  ;;  %v627_v18 = vadd.f32 %v619_v45, %v556_v0  ;;  %v1154_v23 = vld [vmem:[%s1043_s17 + $0x16] ss:$8 sm:$0x3]  ;;  %v486_v25 = vadd.f32 %v478_v58, %v415_v10 }
  0x1f   : > { %v274_v20 = vmul.f32 %v243_v1, %v1052_v4  ;;  %v337_v21 = vmul.f32 %v1059_v8, %v306_v3  ;;  %v519_v22 = vrot.slane %v923_v14, %v1036_v2  ;;  %v941_v29 = vld [vmem:[%s1043_s17 + $0x17] ss:$8 sm:$0x3]  ;;  %v661_v38 = vrot.slane %v1154_v23, %v1036_v2  ;;  %v906_v1 = vld [vmem:[%s1043_s17 + $0x21] ss:$8 sm:$0x3] }
  0x20   : > { %v408_v27 = vmul.f32 %v1064_v11, %v377_v12  ;;  %v698_v30 = vadd.f32 %v690_v53, %v627_v18  ;;  %v479_v35 = vmul.f32 %v1070_v15, %v448_v13  ;;  %v557_v36 = vadd.f32 %v549_v59, %v486_v25  ;;  %v902_v59 = vld [vmem:[%s1043_s17 + $0x20] ss:$8 sm:$0x3]  ;;  %v912_v3 = vld [vmem:[%s1043_s17 + $0x22] ss:$8 sm:$0x3] }
  0x21   : > { %v345_v33 = vadd.f32 %v337_v21, %v274_v20  ;;  %v550_v37 = vmul.f32 %v1076_v19, %v519_v22  ;;  %v275_v39 = vmul.f32 %v247_v9, %v1104_v41  ;;  %v732_v45 = vrot.slane %v941_v29, %v1036_v2  ;;  %v918_v12 = vld [vmem:[%s1043_s17 + $0x23] ss:$8 sm:$0x3]  ;;  %v924_v13 = vld [vmem:[%s1043_s17 + $0x24] ss:$8 sm:$0x3] }
  0x22   : > { %v769_v40 = vadd.f32 %v761_v54, %v698_v30  ;;  %v338_v46 = vmul.f32 %v1107_v42, %v310_v17  ;;  %v628_v47 = vadd.f32 %v620_v60, %v557_v36  ;;  %v621_v48 = vmul.f32 %v1083_v24, %v590_v28  ;;  %v930_v20 = vld [vmem:[%s1043_s17 + $0x25] ss:$8 sm:$0x3] }
  0x23   : > { %v416_v44 = vadd.f32 %v408_v27, %v345_v33  ;;  %v381_v52 = vrot.slane %v911_v6, %v1054_v5  ;;  %v452_v53 = vrot.slane %v917_v7, %v1054_v5  ;;  %v523_v54 = vrot.slane %v923_v14, %v1054_v5 }
  0x24   : > { %777 = vst [vmem:[%s1167_s23] sm:$0x1f] %v769_v40  ;;  %v346_v57 = vadd.f32 %v338_v46, %v275_v39  ;;  %v594_v58 = vrot.slane %v929_v16, %v1054_v5  ;;  %v699_v62 = vadd.f32 %v691_v26, %v628_v47  ;;  %v692_v60 = vmul.f32 %v1091_v31, %v661_v38 }
  0x25   : > { %v487_v56 = vadd.f32 %v479_v35, %v416_v44  ;;  %v409_v63 = vmul.f32 %v1110_v43, %v381_v52  ;;  %v480_v0 = vmul.f32 %v1118_v49, %v452_v53  ;;  %v763_v7 = vmul.f32 %v1096_v34, %v732_v45 }
  0x26   : > { %v551_v9 = vmul.f32 %v1121_v50, %v523_v54  ;;  %v665_v10 = vrot.slane %v1154_v23, %v1054_v5  ;;  %v770_v14 = vadd.f32 %v762_v32, %v699_v62  ;;  %v736_v17 = vrot.slane %v941_v29, %v1054_v5  ;;  %v936_v29 = vld [vmem:[%s1043_s17 + $0x26] ss:$8 sm:$0x3] }
  0x27   : > { %v558_v6 = vadd.f32 %v550_v37, %v487_v56  ;;  %v417_v16 = vadd.f32 %v409_v63, %v346_v57  ;;  %v251_v18 = vrot.slane %v902_v59, %v1036_v2  ;;  %v622_v22 = vmul.f32 %v1124_v51, %v594_v58  ;;  %v942_v37 = vld [vmem:[%s1043_s17 + $0x27] ss:$8 sm:$0x3] }
  0x28   : > { %v314_v25 = vrot.slane %v906_v1, %v1036_v2  ;;  %v385_v26 = vrot.slane %v912_v3, %v1036_v2  ;;  %778 = vst [vmem:[%s1167_s23 + $0x8] sm:$0x1f] %v770_v14  ;;  %v456_v28 = vrot.slane %v918_v12, %v1036_v2  ;;  %v527_v30 = vrot.slane %v924_v13, %v1036_v2  ;;  %v907_v14 = vld [vmem:[%s1043_s17 + $0x31] ss:$8 sm:$0x3] }
  0x29   : > { %v629_v21 = vadd.f32 %v621_v48, %v558_v6  ;;  %v488_v23 = vadd.f32 %v480_v0, %v417_v16  ;;  %v276_v27 = vmul.f32 %v251_v18, %v1052_v4  ;;  %v598_v36 = vrot.slane %v930_v20, %v1036_v2 }
  0x2a   : > { %v339_v33 = vmul.f32 %v1059_v8, %v314_v25  ;;  %v410_v35 = vmul.f32 %v1064_v11, %v385_v26  ;;  %v693_v39 = vmul.f32 %v1129_v55, %v665_v10  ;;  %v764_v40 = vmul.f32 %v1136_v61, %v736_v17 }
  0x2b   : > { %v700_v32 = vadd.f32 %v692_v60, %v629_v21  ;;  %v559_v38 = vadd.f32 %v551_v9, %v488_v23  ;;  %v481_v44 = vmul.f32 %v1070_v15, %v456_v28  ;;  %v552_v47 = vmul.f32 %v1076_v19, %v527_v30 }
  0x2c   : > { %v347_v46 = vadd.f32 %v339_v33, %v276_v27  ;;  %v669_v48 = vrot.slane %v936_v29, %v1036_v2  ;;  %v740_v53 = vrot.slane %v942_v37, %v1036_v2  ;;  %v255_v56 = vrot.slane %v902_v59, %v1054_v5  ;;  %v925_v27 = vld [vmem:[%s1043_s17 + $0x34] ss:$8 sm:$0x3]  ;;  %v931_v33 = vld [vmem:[%s1043_s17 + $0x35] ss:$8 sm:$0x3] }
  0x2d   : > { %v771_v45 = vadd.f32 %v763_v7, %v700_v32  ;;  %v630_v52 = vadd.f32 %v622_v22, %v559_v38  ;;  %v318_v57 = vrot.slane %v906_v1, %v1054_v5  ;;  %v623_v58 = vmul.f32 %v1083_v24, %v598_v36  ;;  %v903_v7 = vld [vmem:[%s1043_s17 + $0x30] ss:$8 sm:$0x3] }
  0x2e   : > { %v418_v54 = vadd.f32 %v410_v35, %v347_v46  ;;  %v389_v62 = vrot.slane %v912_v3, %v1054_v5  ;;  %v460_v60 = vrot.slane %v918_v12, %v1054_v5  ;;  %v277_v0 = vmul.f32 %v255_v56, %v1104_v41  ;;  %v913_v12 = vld [vmem:[%s1043_s17 + $0x32] ss:$8 sm:$0x3] }
  0x2f   : > { %779 = vst [vmem:[%s1167_s23 + $0x10] sm:$0x1f] %v771_v45  ;;  %v701_v63 = vadd.f32 %v693_v39, %v630_v52  ;;  %v340_v6 = vmul.f32 %v1107_v42, %v318_v57  ;;  %v531_v59 = vrot.slane %v924_v13, %v1054_v5  ;;  %v694_v9 = vmul.f32 %v1091_v31, %v669_v48  ;;  %v919_v13 = vld [vmem:[%s1043_s17 + $0x33] ss:$8 sm:$0x3] }
  0x30   : > { %v489_v1 = vadd.f32 %v481_v44, %v418_v54  ;;  %v411_v10 = vmul.f32 %v1110_v43, %v389_v62  ;;  %v602_v3 = vrot.slane %v930_v20, %v1054_v5  ;;  %v765_v17 = vmul.f32 %v1096_v34, %v740_v53  ;;  %v937_v45 = vld [vmem:[%s1043_s17 + $0x36] ss:$8 sm:$0x3]  ;;  %v943_v52 = vld [vmem:[%s1043_s17 + $0x37] ss:$8 sm:$0x3] }
  0x31   : > { %v772_v16 = vadd.f32 %v764_v40, %v701_v63  ;;  %v348_v18 = vadd.f32 %v340_v6, %v277_v0  ;;  %v482_v21 = vmul.f32 %v1118_v49, %v460_v60  ;;  %v553_v25 = vmul.f32 %v1121_v50, %v531_v59 }
  0x32   : > { %v560_v22 = vadd.f32 %v552_v47, %v489_v1  ;;  %v673_v26 = vrot.slane %v936_v29, %v1054_v5  ;;  %v259_v23 = vrot.slane %v903_v7, %v1036_v2  ;;  %v744_v28 = vrot.slane %v942_v37, %v1054_v5 }
  0x33   : > { %780 = vst [vmem:[%s1167_s23 + $0x18] sm:$0x1f] %v772_v16  ;;  %v419_v20 = vadd.f32 %v411_v10, %v348_v18  ;;  %v322_v30 = vrot.slane %v907_v14, %v1036_v2  ;;  %v393_v32 = vrot.slane %v913_v12, %v1036_v2  ;;  %v624_v36 = vmul.f32 %v1124_v51, %v602_v3 }
  0x34   : > { %v631_v35 = vadd.f32 %v623_v58, %v560_v22  ;;  %v278_v38 = vmul.f32 %v259_v23, %v1052_v4  ;;  %v464_v29 = vrot.slane %v919_v13, %v1036_v2  ;;  %v535_v37 = vrot.slane %v925_v27, %v1036_v2 }
  0x35   : > { %v490_v39 = vadd.f32 %v482_v21, %v419_v20  ;;  %v341_v40 = vmul.f32 %v1059_v8, %v322_v30  ;;  %v412_v44 = vmul.f32 %v1064_v11, %v393_v32  ;;  %v695_v47 = vmul.f32 %v1129_v55, %v673_v26 }
  0x36   : > { %v702_v46 = vadd.f32 %v694_v9, %v631_v35  ;;  %v606_v48 = vrot.slane %v931_v33, %v1036_v2  ;;  %v766_v4 = vmul.f32 %v1136_v61, %v744_v28  ;;  %v483_v57 = vmul.f32 %v1070_v15, %v464_v29 }
  0x37   : > { %v561_v53 = vadd.f32 %v553_v25, %v490_v39  ;;  %v349_v56 = vadd.f32 %v341_v40, %v278_v38  ;;  %v554_v8 = vmul.f32 %v1076_v19, %v535_v37  ;;  %v677_v11 = vrot.slane %v937_v45, %v1036_v2 }
  0x38   : > { %v773_v54 = vadd.f32 %v765_v17, %v702_v46  ;;  %v263_v58 = vrot.slane %v903_v7, %v1054_v5  ;;  %v748_v63 = vrot.slane %v943_v52, %v1036_v2  ;;  %v326_v0 = vrot.slane %v907_v14, %v1054_v5 }
  0x39   : > { %v632_v62 = vadd.f32 %v624_v36, %v561_v53  ;;  %v420_v60 = vadd.f32 %v412_v44, %v349_v56  ;;  %v625_v6 = vmul.f32 %v1083_v24, %v606_v48  ;;  %v397_v15 = vrot.slane %v913_v12, %v1054_v5 }
  0x3a   : > { %781 = vst [vmem:[%s1167_s23 + $0x20] sm:$0x1f] %v773_v54  ;;  %v279_v59 = vmul.f32 %v263_v58, %v1104_v41  ;;  %v468_v19 = vrot.slane %v919_v13, %v1054_v5  ;;  %v342_v7 = vmul.f32 %v1107_v42, %v326_v0  ;;  %v539_v10 = vrot.slane %v925_v27, %v1054_v5 }
  0x3b   : > { %v703_v1 = vadd.f32 %v695_v47, %v632_v62  ;;  %v491_v9 = vadd.f32 %v483_v57, %v420_v60  ;;  %v696_v2 = vmul.f32 %v1091_v31, %v677_v11  ;;  %v413_v3 = vmul.f32 %v1110_v43, %v397_v15 }
  0x3c   : > { %v610_v14 = vrot.slane %v931_v33, %v1054_v5  ;;  %v350_v41 = vadd.f32 %v342_v7, %v279_v59  ;;  %v484_v12 = vmul.f32 %v1118_v49, %v468_v19  ;;  %v767_v17 = vmul.f32 %v1096_v34, %v748_v63 }
  0x3d   : > { %v774_v24 = vadd.f32 %v766_v4, %v703_v1  ;;  %v562_v16 = vadd.f32 %v554_v8, %v491_v9  ;;  %v555_v21 = vmul.f32 %v1121_v50, %v539_v10  ;;  %v681_v31 = vrot.slane %v937_v45, %v1054_v5 }
  0x3e   : > { %v421_v42 = vadd.f32 %v413_v3, %v350_v41  ;;  %v626_v22 = vmul.f32 %v1124_v51, %v610_v14  ;;  %v752_v25 = vrot.slane %v943_v52, %v1054_v5 }
  0x3f   : > { %782 = vst [vmem:[%s1167_s23 + $0x28] sm:$0x1f] %v774_v24  ;;  %v633_v18 = vadd.f32 %v625_v6, %v562_v16  ;;  %v697_v49 = vmul.f32 %v1129_v55, %v681_v31 }
  0x40   : > { %v492_v43 = vadd.f32 %v484_v12, %v421_v42  ;;  %v768_v27 = vmul.f32 %v1136_v61, %v752_v25 }
  0x41   : > { %v704_v13 = vadd.f32 %v696_v2, %v633_v18 }
  0x42   : > { %v563_v23 = vadd.f32 %v555_v21, %v492_v43 }
  0x43   : > { %v775_v26 = vadd.f32 %v767_v17, %v704_v13 }
  0x44   : > { %v634_v34 = vadd.f32 %v626_v22, %v563_v23 }
  0x45   : > { %783 = vst [vmem:[%s1167_s23 + $0x30] sm:$0x1f] %v775_v26 }
  0x46   : > { %v705_v20 = vadd.f32 %v697_v49, %v634_v34 }
  0x48   : > { %v776_v28 = vadd.f32 %v768_v27, %v705_v20 }
  0x4a   : > { %784 = vst [vmem:[%s1167_s23 + $0x38] sm:$0x1f] %v776_v28 }
  0x4b PF: > { %s12_s11 = sadd.s32 1, %s997_s11   ;;  %s1291_s9 = smov %s993_s10 }
  0x4c   : > { %p9_p5 = scmp.ge.s32.totalorder %s12_s11, 4   ;;  %s1292_s10 = smov %s1294_s12 }
  0x4e   :  { %11 = sbr.rel (!%p9_p5) target bundleno = 2 (0x2), region = 99 }

</bundles_post_ra>
